<compile_context>
chip_gen: v7x
topology: tpu7x:2x2x1
jax: 0.10.0
libtpu: 0.0.40
codegen_flags: <defaults>
</compile_context>

<pallas_src>
import math
import jax
import jax.numpy as jnp
from jax.experimental import pallas as pl
from jax.experimental.pallas import tpu as pltpu


def _round_up(x, m):
    return ((x + m - 1) // m) * m


def gin_kernel(a_ref, x_ref, w1_ref, w2_ref, bias_ref, bn_ref, o_ref):
    tb, n, d_in = x_ref.shape
    hp = o_ref.shape[-1]

    # Neighborhood aggregation: A_gin @ X ((1+eps)*I already folded into A_gin).
    y = jnp.einsum("bij,bjd->bid", a_ref[...], x_ref[...],
                   preferred_element_type=jnp.float32)
    # Flatten the packed graphs so the MLP matmuls see M = tb * n rows.
    y = y.reshape(tb * n, d_in)

    b1 = bias_ref[0:1, :]
    b2 = bias_ref[1:2, :]
    s1 = bn_ref[:, 0:1]
    t1 = bn_ref[:, 1:2]
    s2 = bn_ref[:, 2:3]
    t2 = bn_ref[:, 3:4]

    # Linear 1 -> Dropout(eval: identity) -> ReLU -> BatchNorm1d (folded scale/shift)
    h = jnp.dot(y, w1_ref[...], preferred_element_type=jnp.float32) + b1
    h = jnp.maximum(h, 0.0)
    h = h * s1 + t1
    # Linear 2 -> Dropout(eval: identity) -> ReLU -> BatchNorm1d (folded scale/shift)
    h = jnp.dot(h, w2_ref[...], preferred_element_type=jnp.float32) + b2
    h = jnp.maximum(h, 0.0)
    h = h * s2 + t2

    o_ref[...] = h.reshape(tb, n, hp).astype(o_ref.dtype)


def gin_forward(A, X, params, *, rows_target=256):
    batch, N, _ = A.shape
    D_in = X.shape[-1]
    H = params["w1"].shape[1]
    Hp = _round_up(H, 128)
    f32 = jnp.float32

    eps = params["eps"][0].astype(f32)
    # Fold (1 + eps) * I into the adjacency once, outside the kernel.
    A_gin = A.astype(f32) + (1.0 + eps) * jnp.eye(N, dtype=f32)[None]
    Xf = X.astype(f32)

    # Graphs packed per grid step: target ~rows_target MLP rows, bounded by
    # the batch size and a conservative VMEM budget (double-buffered blocks).
    tb = max(1, min(batch, rows_target // max(N, 1)))
    bytes_per_graph = 4 * (N * N + N * D_in + N * Hp)
    vmem_budget = 24 * 1024 * 1024  # headroom below the 32 MiB scoped default
    while tb > 1 and 2 * tb * bytes_per_graph > vmem_budget:
        tb -= 1
    padded_batch = _round_up(batch, tb)
    if padded_batch != batch:
        pad = padded_batch - batch
        A_gin = jnp.pad(A_gin, ((0, pad), (0, 0), (0, 0)))
        Xf = jnp.pad(Xf, ((0, pad), (0, 0), (0, 0)))

    # Zero-pad the hidden dim so weights / output are lane dense (128-wide).
    w1 = jnp.zeros((D_in, Hp), f32).at[:, :H].set(params["w1"].astype(f32))
    w2 = jnp.zeros((Hp, Hp), f32).at[:H, :H].set(params["w2"].astype(f32))
    bias = jnp.zeros((2, Hp), f32)
    bias = bias.at[0, :H].set(params["b1"].astype(f32))
    bias = bias.at[1, :H].set(params["b2"].astype(f32))

    # Eval-mode BatchNorm1d(N): fold into per-node scale/shift, tiled over
    # the packed graphs so it lines up with the flattened (tb*N) rows.
    def fold_bn(gamma, beta, rm, rv, eps_bn=1e-5):
        scale = gamma / jnp.sqrt(rv + eps_bn)
        shift = beta - rm * scale
        return scale.astype(f32), shift.astype(f32)

    s1, t1 = fold_bn(params["bn1_w"], params["bn1_b"],
                     params["bn1_rm"], params["bn1_rv"])
    s2, t2 = fold_bn(params["bn2_w"], params["bn2_b"],
                     params["bn2_rm"], params["bn2_rv"])
    bn = jnp.stack([s1, t1, s2, t2], axis=-1)   # (N, 4)
    bn = jnp.tile(bn, (tb, 1))                  # (tb*N, 4)

    grid = (padded_batch // tb,)
    out = pl.pallas_call(
        gin_kernel,
        out_shape=jax.ShapeDtypeStruct((padded_batch, N, Hp), f32),
        grid_spec=pltpu.PrefetchScalarGridSpec(
            num_scalar_prefetch=0,
            grid=grid,
            in_specs=[
                pl.BlockSpec((tb, N, N), lambda b: (b, 0, 0)),      # A_gin
                pl.BlockSpec((tb, N, D_in), lambda b: (b, 0, 0)),   # X
                pl.BlockSpec((D_in, Hp), lambda b: (0, 0)),         # W1 (padded)
                pl.BlockSpec((Hp, Hp), lambda b: (0, 0)),           # W2 (padded)
                pl.BlockSpec((2, Hp), lambda b: (0, 0)),            # biases (b1; b2)
                pl.BlockSpec((tb * N, 4), lambda b: (0, 0)),        # BN s1,t1,s2,t2
            ],
            out_specs=pl.BlockSpec((tb, N, Hp), lambda b: (b, 0, 0)),
        ),
        compiler_params=pltpu.CompilerParams(
            dimension_semantics=("parallel",)),
    )(A_gin, Xf, w1, w2, bias, bn)

    return out[:batch, :, :H]


def gin_reference(A, X, params):
    """Pure-JAX reference mirroring the PyTorch forward (eval mode)."""
    eps = params["eps"][0]
    batch, N, _ = A.shape
    identity = jnp.eye(N, dtype=A.dtype)[None]
    A_gin = (1.0 + eps) * identity + A
    Y = A_gin @ X

    def bn(x, g, b, rm, rv):
        return ((x - rm[None, :, None]) / jnp.sqrt(rv[None, :, None] + 1e-5)
                * g[None, :, None] + b[None, :, None])

    h = Y @ params["w1"] + params["b1"]
    h = jax.nn.relu(h)
    h = bn(h, params["bn1_w"], params["bn1_b"], params["bn1_rm"], params["bn1_rv"])
    h = h @ params["w2"] + params["b2"]
    h = jax.nn.relu(h)
    h = bn(h, params["bn2_w"], params["bn2_b"], params["bn2_rm"], params["bn2_rv"])
    return h


def init_params(key, input_dim, hidden_dim, batchnorm_dim):
    ks = jax.random.split(key, 12)
    f32 = jnp.float32
    params = {
        # eps: nn.init.constant_(eps, 0.1 / sqrt(1))
        "eps": jnp.full((1,), 0.1 / math.sqrt(1.0), dtype=f32),
        # Linear 1: (input_dim -> hidden_dim), stored as (in, out)
        "w1": jax.random.uniform(ks[0], (input_dim, hidden_dim), f32,
                                 -1.0 / math.sqrt(input_dim), 1.0 / math.sqrt(input_dim)),
        "b1": jax.random.uniform(ks[1], (hidden_dim,), f32,
                                 -1.0 / math.sqrt(input_dim), 1.0 / math.sqrt(input_dim)),
        # BatchNorm1d(batchnorm_dim) #1 (eval-mode stats)
        "bn1_w": 1.0 + 0.1 * jax.random.normal(ks[2], (batchnorm_dim,), f32),
        "bn1_b": 0.1 * jax.random.normal(ks[3], (batchnorm_dim,), f32),
        "bn1_rm": 0.1 * jax.random.normal(ks[4], (batchnorm_dim,), f32),
        "bn1_rv": 1.0 + 0.1 * jnp.abs(jax.random.normal(ks[5], (batchnorm_dim,), f32)),
        # Linear 2: (hidden_dim -> hidden_dim)
        "w2": jax.random.uniform(ks[6], (hidden_dim, hidden_dim), f32,
                                 -1.0 / math.sqrt(hidden_dim), 1.0 / math.sqrt(hidden_dim)),
        "b2": jax.random.uniform(ks[7], (hidden_dim,), f32,
                                 -1.0 / math.sqrt(hidden_dim), 1.0 / math.sqrt(hidden_dim)),
        # BatchNorm1d(batchnorm_dim) #2
        "bn2_w": 1.0 + 0.1 * jax.random.normal(ks[8], (batchnorm_dim,), f32),
        "bn2_b": 0.1 * jax.random.normal(ks[9], (batchnorm_dim,), f32),
        "bn2_rm": 0.1 * jax.random.normal(ks[10], (batchnorm_dim,), f32),
        "bn2_rv": 1.0 + 0.1 * jnp.abs(jax.random.normal(ks[11], (batchnorm_dim,), f32)),
    }
    return params


if __name__ == "__main__":
    batch, N, input_dim, hidden_dim = 2, 8, 16, 32
    batchnorm_dim = N  # BatchNorm1d channel axis == number of nodes

    key = jax.random.PRNGKey(0)
    k_a, k_x, k_p = jax.random.split(key, 3)

    # Symmetric-ish adjacency with zero diagonal, X node features.
    A_raw = jax.random.uniform(k_a, (batch, N, N), jnp.float32)
    A = (A_raw + jnp.swapaxes(A_raw, 1, 2)) * 0.5
    A = A * (1.0 - jnp.eye(N, dtype=jnp.float32)[None])
    X = jax.random.normal(k_x, (batch, N, input_dim), jnp.float32)

    params = init_params(k_p, input_dim, hidden_dim, batchnorm_dim)

    out = gin_forward(A, X, params)
    out = jax.block_until_ready(out)

    ref = gin_reference(A, X, params)
    if not jnp.allclose(out, ref, atol=1e-4, rtol=1e-4):
        raise AssertionError("Pallas GIN output mismatch vs reference")

    print("KERNEL_OK")
</pallas_src>

<mosaic_0001>
module attributes {stable_mosaic.version = 11 : i64} {
  func.func @gin_kernel(%arg0: i32, %arg1: memref<2x8x8xf32, #tpu.memory_space<vmem>>, %arg2: memref<2x8x16xf32, #tpu.memory_space<vmem>>, %arg3: memref<16x128xf32, #tpu.memory_space<vmem>>, %arg4: memref<128x128xf32, #tpu.memory_space<vmem>>, %arg5: memref<2x128xf32, #tpu.memory_space<vmem>>, %arg6: memref<16x4xf32, #tpu.memory_space<vmem>>, %arg7: memref<2x8x128xf32, #tpu.memory_space<vmem>>) attributes {dimension_semantics = [#tpu.dimension_semantics<parallel>], iteration_bounds = array<i64: 1>, scalar_prefetch = 0 : i64, scratch_operands = 0 : i64, tpu.core_type = #tpu.core_type<tc>, window_params = [{transform_indices = @transform_0, window_bounds = array<i64: 2, 8, 8>}, {transform_indices = @transform_1, window_bounds = array<i64: 2, 8, 16>}, {pipeline_mode = #tpu.pipeline_mode<synchronous>, transform_indices = @transform_2, window_bounds = array<i64: 16, 128>}, {pipeline_mode = #tpu.pipeline_mode<synchronous>, transform_indices = @transform_3, window_bounds = array<i64: 128, 128>}, {pipeline_mode = #tpu.pipeline_mode<synchronous>, transform_indices = @transform_4, window_bounds = array<i64: 2, 128>}, {pipeline_mode = #tpu.pipeline_mode<synchronous>, transform_indices = @transform_5, window_bounds = array<i64: 16, 4>}, {transform_indices = @transform_6, window_bounds = array<i64: 2, 8, 128>}]} {
    %c0 = arith.constant 0 : index
    %c0_0 = arith.constant 0 : index
    %c0_1 = arith.constant 0 : index
    %0 = vector.load %arg1[%c0, %c0_0, %c0_1] : memref<2x8x8xf32, #tpu.memory_space<vmem>>, vector<2x8x8xf32>
    %c0_2 = arith.constant 0 : index
    %c0_3 = arith.constant 0 : index
    %c0_4 = arith.constant 0 : index
    %1 = vector.load %arg2[%c0_2, %c0_3, %c0_4] : memref<2x8x16xf32, #tpu.memory_space<vmem>>, vector<2x8x16xf32>
    "tpu.trace_start"() <{level = 10 : i32, message = "bij,bjd->bid"}> : () -> ()
    %cst = arith.constant dense<0.000000e+00> : vector<2x8x16xf32>
    %2 = tpu.matmul %0, %1, %cst {dimension_numbers = #tpu.dot_dimension_numbers<[2], [1], [1], [2], [0, 0, 0, 1, 1, 2], [0], [0]>} : vector<2x8x8xf32>, vector<2x8x16xf32>, vector<2x8x16xf32> -> vector<2x8x16xf32>
    "tpu.trace_stop"() : () -> ()
    %3 = vector.shape_cast %2 : vector<2x8x16xf32> to vector<16x16xf32>
    %c0_5 = arith.constant 0 : index
    %c0_6 = arith.constant 0 : index
    %4 = vector.load %arg5[%c0_5, %c0_6] : memref<2x128xf32, #tpu.memory_space<vmem>>, vector<1x128xf32>
    %c1 = arith.constant 1 : index
    %c0_7 = arith.constant 0 : index
    %5 = vector.load %arg5[%c1, %c0_7] : memref<2x128xf32, #tpu.memory_space<vmem>>, vector<1x128xf32>
    %c0_8 = arith.constant 0 : index
    %c0_9 = arith.constant 0 : index
    %6 = vector.load %arg6[%c0_8, %c0_9] : memref<16x4xf32, #tpu.memory_space<vmem>>, vector<16x1xf32>
    %c0_10 = arith.constant 0 : index
    %c1_11 = arith.constant 1 : index
    %7 = vector.load %arg6[%c0_10, %c1_11] : memref<16x4xf32, #tpu.memory_space<vmem>>, vector<16x1xf32>
    %c0_12 = arith.constant 0 : index
    %c2 = arith.constant 2 : index
    %8 = vector.load %arg6[%c0_12, %c2] : memref<16x4xf32, #tpu.memory_space<vmem>>, vector<16x1xf32>
    %c0_13 = arith.constant 0 : index
    %c3 = arith.constant 3 : index
    %9 = vector.load %arg6[%c0_13, %c3] : memref<16x4xf32, #tpu.memory_space<vmem>>, vector<16x1xf32>
    %c0_14 = arith.constant 0 : index
    %c0_15 = arith.constant 0 : index
    %10 = vector.load %arg3[%c0_14, %c0_15] : memref<16x128xf32, #tpu.memory_space<vmem>>, vector<16x128xf32>
    %cst_16 = arith.constant dense<0.000000e+00> : vector<16x128xf32>
    %11 = tpu.matmul %3, %10, %cst_16 {dimension_numbers = #tpu.dot_dimension_numbers<[1], [0], [0], [1], [0, 0, 1, 1], [], []>} : vector<16x16xf32>, vector<16x128xf32>, vector<16x128xf32> -> vector<16x128xf32>
    %12 = vector.broadcast %4 : vector<1x128xf32> to vector<16x128xf32>
    %13 = arith.addf %11, %12 : vector<16x128xf32>
    %cst_17 = arith.constant 0.000000e+00 : f32
    %14 = vector.broadcast %cst_17 : f32 to vector<16x128xf32>
    %15 = arith.maximumf %13, %14 : vector<16x128xf32>
    %16 = vector.broadcast %6 : vector<16x1xf32> to vector<16x128xf32>
    %17 = arith.mulf %15, %16 : vector<16x128xf32>
    %18 = vector.broadcast %7 : vector<16x1xf32> to vector<16x128xf32>
    %19 = arith.addf %17, %18 : vector<16x128xf32>
    %c0_18 = arith.constant 0 : index
    %c0_19 = arith.constant 0 : index
    %20 = vector.load %arg4[%c0_18, %c0_19] : memref<128x128xf32, #tpu.memory_space<vmem>>, vector<128x128xf32>
    %cst_20 = arith.constant dense<0.000000e+00> : vector<16x128xf32>
    %21 = tpu.matmul %19, %20, %cst_20 {dimension_numbers = #tpu.dot_dimension_numbers<[1], [0], [0], [1], [0, 0, 1, 1], [], []>} : vector<16x128xf32>, vector<128x128xf32>, vector<16x128xf32> -> vector<16x128xf32>
    %22 = vector.broadcast %5 : vector<1x128xf32> to vector<16x128xf32>
    %23 = arith.addf %21, %22 : vector<16x128xf32>
    %cst_21 = arith.constant 0.000000e+00 : f32
    %24 = vector.broadcast %cst_21 : f32 to vector<16x128xf32>
    %25 = arith.maximumf %23, %24 : vector<16x128xf32>
    %26 = vector.broadcast %8 : vector<16x1xf32> to vector<16x128xf32>
    %27 = arith.mulf %25, %26 : vector<16x128xf32>
    %28 = vector.broadcast %9 : vector<16x1xf32> to vector<16x128xf32>
    %29 = arith.addf %27, %28 : vector<16x128xf32>
    %30 = vector.shape_cast %29 : vector<16x128xf32> to vector<2x8x128xf32>
    %c0_22 = arith.constant 0 : index
    %c0_23 = arith.constant 0 : index
    %c0_24 = arith.constant 0 : index
    %31 = vector.load %arg7[%c0_22, %c0_23, %c0_24] : memref<2x8x128xf32, #tpu.memory_space<vmem>>, vector<2x8x128xf32>
    tpu.vector_store %arg7[%c0_22, %c0_23, %c0_24], %30 {strides = array<i32>} : memref<2x8x128xf32, #tpu.memory_space<vmem>>, vector<2x8x128xf32>,
    return
  }
  func.func @transform_0(%arg0: i32) -> (i32, i32, i32) {
    %c0_i32 = arith.constant 0 : i32
    %c0_i32_0 = arith.constant 0 : i32
    %c0_i32_1 = arith.constant 0 : i32
    return %arg0, %c0_i32, %c0_i32_0 : i32, i32, i32
  }
  func.func @transform_1(%arg0: i32) -> (i32, i32, i32) {
    %c0_i32 = arith.constant 0 : i32
    %c0_i32_0 = arith.constant 0 : i32
    %c0_i32_1 = arith.constant 0 : i32
    return %arg0, %c0_i32, %c0_i32_0 : i32, i32, i32
  }
  func.func @transform_2(%arg0: i32) -> (i32, i32) {
    %c0_i32 = arith.constant 0 : i32
    %c0_i32_0 = arith.constant 0 : i32
    %c0_i32_1 = arith.constant 0 : i32
    return %c0_i32, %c0_i32_0 : i32, i32
  }
  func.func @transform_3(%arg0: i32) -> (i32, i32) {
    %c0_i32 = arith.constant 0 : i32
    %c0_i32_0 = arith.constant 0 : i32
    %c0_i32_1 = arith.constant 0 : i32
    return %c0_i32, %c0_i32_0 : i32, i32
  }
  func.func @transform_4(%arg0: i32) -> (i32, i32) {
    %c0_i32 = arith.constant 0 : i32
    %c0_i32_0 = arith.constant 0 : i32
    %c0_i32_1 = arith.constant 0 : i32
    return %c0_i32, %c0_i32_0 : i32, i32
  }
  func.func @transform_5(%arg0: i32) -> (i32, i32) {
    %c0_i32 = arith.constant 0 : i32
    %c0_i32_0 = arith.constant 0 : i32
    %c0_i32_1 = arith.constant 0 : i32
    return %c0_i32, %c0_i32_0 : i32, i32
  }
  func.func @transform_6(%arg0: i32) -> (i32, i32, i32) {
    %c0_i32 = arith.constant 0 : i32
    %c0_i32_0 = arith.constant 0 : i32
    %c0_i32_1 = arith.constant 0 : i32
    return %arg0, %c0_i32, %c0_i32_0 : i32, i32, i32
  }
}

</mosaic_0001>

<bundles_post_ra>
// kernel: tpu_custom_call.1
= control target key start
LH: loop header
LB: loop body
LE: loop exit
PB: predicated region body
PF: predicated region fallthrough
CT: control target
= control target key end

     0   :  { %11 = vsyncpa [#allocation3], 0  ;;  %s839_s0 = inlined_call_operand.vmem [shape: f32[2,8,8], index: 0, kind: input, shape index: {}]   ;;  %s840_s1 = inlined_call_operand.hbm [shape: f32[2,8,16], index: 1, kind: input, shape index: {}]   ;;  %s841_s2 = inlined_call_operand.hbm [shape: f32[16,128], index: 2, kind: input, shape index: {}]   ;;  %s842_s3 = inlined_call_operand.hbm [shape: f32[128,128], index: 3, kind: input, shape index: {}]   ;;  %s843_s4 = inlined_call_operand.vmem [shape: f32[2,128], index: 4, kind: input, shape index: {}]   ;;  %s844_s5 = inlined_call_operand.vmem [shape: f32[16,4], index: 5, kind: input, shape index: {}]   ;;  %s845_s6 = inlined_call_operand.hbm [shape: f32[2,8,128], index: 6, kind: output, shape index: {}]  }
   0x1   :  { %12 = vsyncpa [#allocation6], 0 }
   0x2   :  { %13 = vsyncpa [#allocation4], 0  ;;  %s701_s21 = smov [#allocation5]   ;;  %s702_s23 = smov [#allocation2]  }
   0x3   :  { %s33_s22 = sshll.u32 %s701_s21, 4  ;;  %s21_s24 = sshll.u32 %s702_s23, 4  ;;  %s34_s22 = int_to_ptr.vmem [resolvable:$true] %s33_s22  ;;  %s748_s24 = int_to_ptr.vmem [resolvable:$true] %s21_s24 }
   0x4   :  { %s607_s27 = scalar_lea.hbm %s841_s2, 256 }
   0x5   :  { %p608_p0 = scmp.ne.s32.totalorder %s841_s2, %s607_s27  ;;  %p611_p1 = scmp.lt.u32.totalorder %s607_s27, %s841_s2 }
   0x7   :  { %p613_p2 = pnand %p611_p1, %p608_p0 }
   0x9   :  { %616 = shalt.err (!%p613_p2)
}
   0xa   :  { %s617_s8 = scalar_lea.vmem %s34_s22, 256  ;;  %p622_p4 = scmp.lt.s32.totalorder %s34_s22, %s34_s22 }
   0xb   :  { %p618_p3 = scmp.ne.s32.totalorder %s34_s22, %s617_s8  ;;  %p623_p5 = scmp.lt.s32.totalorder %s617_s8, %s617_s8 }
   0xd   :  { %p624_p6 = por %p623_p5, %p622_p4 }
   0xf   :  { %p625_p7 = pnand %p624_p6, %p618_p3 }
  0x11   :  { %628 = shalt.err (!%p625_p7)
}
  0x12   :  { %s703_s9 = smov 128   ;;  %s704_s10 = smov 8  }
  0x13   :  { %39 = dma.hbm_to_vmem [thread:$0]  %s841_s2, 256, %s34_s22, [#allocation6], %s703_s9, %s703_s9, %s704_s10  }
  0x14   :  { %s629_s15 = scalar_lea.hbm %s840_s1, 256 }
  0x15   :  { %p630_p8 = scmp.ne.s32.totalorder %s840_s1, %s629_s15  ;;  %p633_p9 = scmp.lt.u32.totalorder %s629_s15, %s840_s1 }
  0x17   :  { %p635_p10 = pnand %p633_p9, %p630_p8 }
  0x19   :  { %638 = shalt.err (!%p635_p10)
}
  0x1a   :  { %s639_s20 = scalar_lea.vmem %s748_s24, 256  ;;  %p644_p12 = scmp.lt.s32.totalorder %s748_s24, %s748_s24 }
  0x1b   :  { %p640_p11 = scmp.ne.s32.totalorder %s748_s24, %s639_s20  ;;  %p645_p13 = scmp.lt.s32.totalorder %s639_s20, %s639_s20 }
  0x1d   :  { %p646_p0 = por %p645_p13, %p644_p12 }
  0x1f   :  { %p647_p1 = pnand %p646_p0, %p640_p11 }
  0x21   :  { %650 = shalt.err (!%p647_p1)
}
  0x22   :  { %27 = dma.hbm_to_vmem [thread:$0]  %s840_s1, 256, %s748_s24, [#allocation3], %s703_s9, %s703_s9, %s704_s10  }
  0x23   :  { %s705_s22 = smov [#allocation7]   ;;  %s651_s27 = scalar_lea.hbm %s842_s3, 2048 }
  0x24   :  { %s45_s23 = sshll.u32 %s705_s22, 4  ;;  %p652_p2 = scmp.ne.s32.totalorder %s842_s3, %s651_s27  ;;  %s46_s23 = int_to_ptr.vmem [resolvable:$true] %s45_s23 }
  0x25   :  { %p655_p3 = scmp.lt.u32.totalorder %s651_s27, %s842_s3 }
  0x27   :  { %p657_p4 = pnand %p655_p3, %p652_p2 }
  0x29   :  { %660 = shalt.err (!%p657_p4)
}
  0x2a   :  { %s661_s8 = scalar_lea.vmem %s46_s23, 2048  ;;  %p666_p6 = scmp.lt.s32.totalorder %s46_s23, %s46_s23 }
  0x2b   :  { %p662_p5 = scmp.ne.s32.totalorder %s46_s23, %s661_s8  ;;  %p667_p7 = scmp.lt.s32.totalorder %s661_s8, %s661_s8 }
  0x2d   :  { %p668_p8 = por %p667_p7, %p666_p6 }
  0x2f   :  { %p669_p9 = pnand %p668_p8, %p662_p5 }
  0x31   :  { %672 = shalt.err (!%p669_p9)
}
  0x32   :  { %51 = dma.hbm_to_vmem [thread:$0]  %s842_s3, 2048, %s46_s23, [#allocation6], %s703_s9, %s703_s9, %s704_s10  }
  0x33   :  { %695 = dma.done.wait [#allocation3], 256  }
  0x34   :  { %696 = vsyncadd [#allocation3], 4294967040 }
  0x35   :  { %697 = dma.done.wait [#allocation6], 2304  }
  0x36   :  { %698 = vsyncadd [#allocation6], 4294964992  ;;  %v706_v0 = vmov 0.0   ;;  %vm707_vm0 = vmmov 0   ;;  %vm69_vm1 = vcmask 64512   ;;  %v67_v1 = vld [vmem:[#allocation2] sm:$0xff] }
  0x37   :  { %501 = vmatprep.subr.mxu0 %v706_v0  ;;  %503 = vmatprep.mubr.msk.f32.mxu0 %vm707_vm0, %v706_v0  ;;  %v65_v2 = vld [vmem:[%s839_s0] sm:$0xff]  ;;  %v68_v3 = vld [vmem:[#allocation2 + $0x8] sm:$0xff]  ;;  %v220_v5 = vld [vmem:[#allocation5] sm:$0xff]  ;;  %v708_v10 = vmov 0   ;;  %v709_v11 = vmov 1   ;;  %vm226_vm2 = vcmask 130048  }
  0x38   :  { %502 = vmatpush3.msra.mxu0 %v67_v1  ;;  %v66_v4 = vld [vmem:[%s839_s0 + $0x8] sm:$0xff]  ;;  %v221_v6 = vld [vmem:[#allocation5 + $0x8] sm:$0xff]  ;;  %v809_v8 = vld [vmem:[%s844_s5] sm:$0xff]  ;;  %601 = vset.pattern.permute.xlu0 %v708_v10  ;;  %v710_v40 = vmov 2   ;;  %v711_v41 = vmov 3   ;;  %s712_s20 = smov [#allocation8]  }
  0x39   :  { %504 = vmatmul.mubr.msk.f32.vlgmr.msra.gmra.mrb[0].mxu0 %vm69_vm1, %v65_v2  ;;  %506 = vmatprep.subr.mxu0 %v706_v0  ;;  %v553_v7 = vpack.c.bf16 %v221_v6, %v220_v5  ;;  %v332_v9 = vld [vmem:[#allocation7] sm:$0xff]  ;;  %v333_v12 = vld [vmem:[#allocation7 + $0x8] sm:$0xff]  ;;  %v334_v13 = vld [vmem:[#allocation7 + $0x10] sm:$0xff]  ;;  %s456_s2 = sshll.u32 %s712_s20, 4  ;;  %s457_s2 = int_to_ptr.vmem [resolvable:$true] %s456_s2 }
  0x3a   :  { %507 = vmatpush3.msra.mxu0 %v68_v3  ;;  %508 = vmatprep.mubr.msk.f32.mxu0 %vm707_vm0, %v706_v0  ;;  %v335_v14 = vld [vmem:[#allocation7 + $0x18] sm:$0xff]  ;;  %v557_v15 = vpack.c.bf16 %v333_v12, %v332_v9  ;;  %v219_v16 = vld [vmem:[%s844_s5 + $0x8] sm:$0xff]  ;;  %v336_v18 = vld [vmem:[#allocation7 + $0x20] sm:$0xff]  ;;  %p678_p11 = scmp.lt.s32.totalorder %s457_s2, %s457_s2 }
  0x3b   :  { %554 = vmatprep.subr.bf16.mxu0 %v553_v7  ;;  %602 = vset.pattern.permute.xlu1 %v709_v11  ;;  %v561_v17 = vpack.c.bf16 %v335_v14, %v334_v13  ;;  %v337_v19 = vld [vmem:[#allocation7 + $0x28] sm:$0xff]  ;;  %v338_v21 = vld [vmem:[#allocation7 + $0x30] sm:$0xff]  ;;  %v339_v22 = vld [vmem:[#allocation7 + $0x38] sm:$0xff] }
  0x3c   :  { %312 = vperm.xlu0 %601, %v809_v8   ;;  %323 = vperm.xlu1 %602, %v809_v8   ;;  %v565_v20 = vpack.c.bf16 %v337_v19, %v336_v18  ;;  %v569_v23 = vpack.c.bf16 %v339_v22, %v338_v21  ;;  %v340_v24 = vld [vmem:[#allocation7 + $0x40] sm:$0xff]  ;;  %v341_v25 = vld [vmem:[#allocation7 + $0x48] sm:$0xff]  ;;  %v342_v27 = vld [vmem:[#allocation7 + $0x50] sm:$0xff] }
  0x3d   :  { %509 = vmatmul.mubr.msk.f32.vlgmr.msra.gmra.mrb[2].mxu0 %vm69_vm1, %v66_v4  ;;  %558 = vmatprep.subr.bf16.mxu1 %v557_v15  ;;  %v573_v26 = vpack.c.bf16 %v341_v25, %v340_v24  ;;  %v343_v28 = vld [vmem:[#allocation7 + $0x58] sm:$0xff]  ;;  %v344_v34 = vld [vmem:[#allocation7 + $0x60] sm:$0xff]  ;;  %v345_v35 = vld [vmem:[#allocation7 + $0x68] sm:$0xff] }
  0x3e   :  { %556 = vmatpush3.bf16.msra.mxu0 %v553_v7  ;;  %560 = vmatpush3.bf16.msra.mxu1 %v557_v15  ;;  %v577_v29 = vpack.c.bf16 %v343_v28, %v342_v27  ;;  %v581_v36 = vpack.c.bf16 %v345_v35, %v344_v34  ;;  %v346_v37 = vld [vmem:[#allocation7 + $0x70] sm:$0xff]  ;;  %v347_v38 = vld [vmem:[#allocation7 + $0x78] sm:$0xff]  ;;  %v471_v43 = vld [vmem:[%s843_s4] ss:$0 sm:$0xff] }
  0x3f   :  { %562 = vmatprep.subr.bf16.mxu1 %v561_v17  ;;  %v585_v39 = vpack.c.bf16 %v347_v38, %v346_v37  ;;  %v474_v57 = vld [vmem:[%s843_s4 + $0x1] ss:$0 sm:$0xff]  ;;  %s673_s4 = scalar_lea.vmem %s457_s2, 256 }
  0x40   :  { %317 = vperm.xlu0 %601, %v219_v16   ;;  %327 = vperm.xlu1 %602, %v219_v16   ;;  %p674_p10 = scmp.ne.s32.totalorder %s457_s2, %s673_s4  ;;  %p679_p12 = scmp.lt.s32.totalorder %s673_s4, %s673_s4 }
  0x42   :  { %564 = vmatpush3.bf16.msra.mxu1 %v561_v17  ;;  %p680_p13 = por %p679_p12, %p678_p11 }
  0x43   :  { %566 = vmatprep.subr.bf16.mxu1 %v565_v20 }
  0x44   :  { %603 = vset.pattern.permute.xlu0 %v710_v40  ;;  %604 = vset.pattern.permute.xlu1 %v710_v40  ;;  %p681_p0 = pnand %p680_p13, %p674_p10 }
  0x45   :  { %430 = vperm.xlu0 %603, %v809_v8   ;;  %434 = vperm.xlu1 %604, %v219_v16  }
  0x46   :  { %568 = vmatpush3.bf16.msra.mxu1 %v565_v20 }
  0x47   :  { %570 = vmatprep.subr.bf16.mxu1 %v569_v23 }
  0x49   :  { %606 = vset.pattern.permute.xlu0 %v711_v41  ;;  %605 = vset.pattern.permute.xlu1 %v711_v41 }
  0x4a   :  { %572 = vmatpush3.bf16.msra.mxu1 %v569_v23  ;;  %444 = vperm.xlu0 %606, %v219_v16  }
  0x4b   :  { %574 = vmatprep.subr.bf16.mxu1 %v573_v26  ;;  %440 = vperm.xlu1 %605, %v809_v8  }
  0x4e   :  { %576 = vmatpush3.bf16.msra.mxu1 %v573_v26 }
  0x4f   :  { %578 = vmatprep.subr.bf16.mxu1 %v577_v29 }
  0x52   :  { %580 = vmatpush3.bf16.msra.mxu1 %v577_v29 }
  0x53   :  { %582 = vmatprep.subr.bf16.mxu1 %v581_v36 }
  0x56   :  { %584 = vmatpush3.bf16.msra.mxu1 %v581_v36 }
  0x57   :  { %586 = vmatprep.subr.bf16.mxu1 %v585_v39 }
  0x5a   :  { %588 = vmatpush3.bf16.msra.mxu1 %v585_v39 }
  0xbb   :  { %v313_v42 = vpop.permute.xlu0 %312  ;;  %v324_v47 = vpop.permute.xlu1 %323 }
  0xbf   :  { %v318_v51 = vpop.permute.xlu0 %317  ;;  %v328_v54 = vpop.permute.xlu1 %327 }
  0xc4   :  { %v431_v58 = vpop.permute.xlu0 %430  ;;  %v435_v59 = vpop.permute.xlu1 %434 }
  0xc9   :  { %v445_v2 = vpop.permute.xlu0 %444 }
  0xca   :  { %v441_v4 = vpop.permute.xlu1 %440 }
 0x10c   :  { %v139_v30 = vpop.f32.mrb[0].mxu0 }
 0x10d   :  { %v505_v31 = vpop.f32.mrb[1].mxu0  ;;  %515 = vmatprep.mubr.msk.f32.mxu0 %vm226_vm2, %v139_v30 }
 0x110   :  { %v212_v32 = vpop.f32.mrb[2].mxu0 }
 0x111   :  { %v510_v33 = vpop.f32.mrb[3].mxu0  ;;  %516 = vmatmul.mubr.msk.f32.vlgmr.msra.gmra.mrb[4].mxu0 %vm226_vm2, %v212_v32 }
 0x1e4   :  { %v517_v44 = vpop.f32.mrb[4].mxu0 }
 0x1e5   :  { %v305_v45 = vadd.f32 %v517_v44, %v471_v43  ;;  %v299_v46 = vpop.f32.mrb[5].mxu0 }
 0x1e6   :  { %v300_v48 = vadd.f32 %v471_v43, %v299_v46 }
 0x1e7   :  { %v309_v49 = vmax.f32 %v305_v45, 0.0 }
 0x1e8   :  { %v308_v50 = vmax.f32 %v300_v48, 0.0 }
 0x1e9   :  { %v321_v52 = vmul.f32 %v318_v51, %v309_v49 }
 0x1ea   :  { %v320_v53 = vmul.f32 %v313_v42, %v308_v50 }
 0x1eb   :  { %v331_v56 = vadd.f32 %v328_v54, %v321_v52 }
 0x1ec   :  { %v330_v55 = vadd.f32 %v324_v47, %v320_v53 }
 0x1ee   :  { %550 = vmatprep.mubr.f32.mxu1 %v330_v55 }
 0x1ef   :  { %551 = vmatmul.mubr.f32.vlgmr.msra.gmra.mrb[0].mxu1 %v331_v56 }
 0x2c2   :  { %v552_v60 = vpop.f32.mrb[0].mxu1 }
 0x2c3   :  { %v424_v61 = vadd.f32 %v552_v60, %v474_v57  ;;  %v418_v62 = vpop.f32.mrb[1].mxu1 }
 0x2c4   :  { %v419_v63 = vadd.f32 %v474_v57, %v418_v62 }
 0x2c5   :  { %v428_v0 = vmax.f32 %v424_v61, 0.0 }
 0x2c6   :  { %v427_v1 = vmax.f32 %v419_v63, 0.0 }
 0x2c7   :  { %v438_v3 = vmul.f32 %v435_v59, %v428_v0 }
 0x2c8   :  { %v437_v5 = vmul.f32 %v431_v58, %v427_v1 }
 0x2c9   :  { %v448_v6 = vadd.f32 %v445_v2, %v438_v3 }
 0x2ca   :  { %v447_v7 = vadd.f32 %v441_v4, %v437_v5 }
 0x2cb   :  { %450 = vst [vmem:[#allocation8 + $0x8] sm:$0xff] %v448_v6 }
 0x2cc   :  { %449 = vst [vmem:[#allocation8] sm:$0xff] %v447_v7 }
 0x2cd   :  { %684 = shalt.err (!%p681_p0)
}
 0x2ce   :  { %s685_s23 = scalar_lea.hbm %s845_s6, 256 }
 0x2cf   :  { %p686_p1 = scmp.ne.s32.totalorder %s845_s6, %s685_s23  ;;  %p689_p2 = scmp.lt.u32.totalorder %s685_s23, %s845_s6 }
 0x2d1   :  { %p691_p3 = pnand %p689_p2, %p686_p1 }
 0x2d3   :  { %694 = shalt.err (!%p691_p3)
}
 0x2d4   :  { %462 = dma.vmem_to_hbm [thread:$0]  %s457_s2, 256, %s845_s6, [#allocation4], %s703_s9, %s703_s9, %s704_s10  }
 0x2d5   :  { %699 = dma.done.wait [#allocation4], 256  }
 0x2d6   :  { %700 = vsyncadd [#allocation4], 4294967040 }
 0x2d7   :  { %466 = vsyncpa [#allocation3], 1 }
 0x2d8   :  { %467 = vsyncpa [#allocation6], 1 }
 0x2d9   :  { %468 = vsyncpa [#allocation4], 1 }

</bundles_post_ra>
